<compile_context>
chip_gen: v5e
topology: v5e:2x2
jax: 0.10.0
libtpu: 0.0.40
codegen_flags: <defaults>
</compile_context>

<pallas_src>
import functools

import jax
import jax.numpy as jnp
from jax.experimental import pallas as pl
from jax.experimental.pallas import tpu as pltpu


def rmsnorm_kernel(x_ref, w_ref, o_ref, *, eps: float, inv_d: float):
    # x_ref: (TS, Dp) block, w_ref: (1, Dp), o_ref: (TS, Dp)
    x = x_ref[...].astype(jnp.float32)                       # f32 accumulation
    w = w_ref[...].astype(jnp.float32)                       # (1, Dp)
    ms = jnp.sum(x * x, axis=-1, keepdims=True) * inv_d      # (TS, 1), true-d mean
    inv_rms = jax.lax.rsqrt(ms + eps)                        # EUP rsqrt
    o_ref[...] = (x * inv_rms * w).astype(o_ref.dtype)


def _sublane_multiple(*dtypes) -> int:
    """Sublane row multiple: 8 for 32-bit, 16 for bf16/fp16, 32 for 8-bit."""
    m = 8
    for dt in dtypes:
        m = max(m, 32 // max(jnp.dtype(dt).itemsize, 1))
    return m


def _vmem_capacity_bytes() -> int:
    try:
        return int(pltpu.get_tpu_info().vmem_capacity_bytes)
    except Exception:  # pragma: no cover - conservative fallback (v7x-sized)
        return 64 * 1024 * 1024


def _pick_block_rows(rows: int, d_pad: int, in_bytes: int, out_bytes: int,
                     sub: int) -> int:
    """Row-tile size: fits VMEM, keeps >=~16 grid steps, sublane-aligned."""
    cap = _vmem_capacity_bytes()
    # Conservative tile budget on 64 MiB parts (v7x), generous on 128 MiB parts.
    budget = 22 * 1024 * 1024 if cap <= 64 * 1024 * 1024 else 64 * 1024 * 1024
    # Working set per row: double-buffered in + out tiles plus ~one f32
    # intermediate (upcast / x*x) live across the row reduction.
    bytes_per_row = d_pad * (2 * in_bytes + 2 * out_bytes + 4)
    ts = budget // max(bytes_per_row, 1)
    ts = min(ts, 2048)                       # per-step overhead plateaus ~1-2k rows
    if ts >= rows:
        return rows                          # single full-extent block (always legal)
    # Keep >= ~16 grid steps so v7x's 2 TCs and the double buffer have work.
    steps_cap = max((pl.cdiv(rows, 16) // sub) * sub, sub)
    ts = min(ts, steps_cap)
    ts = max((ts // sub) * sub, sub)
    if ts >= rows:
        return rows
    # Prefer a nearby tile size that evenly divides rows (no ragged tail).
    if rows % sub == 0:
        cand = ts
        while cand >= max(sub, ts // 2):
            if rows % cand == 0:
                return cand
            cand -= sub
    return ts


def rmsnorm(x: jax.Array, weight: jax.Array, eps: float = 1e-5,
            out_dtype=None, block_rows: int | None = None) -> jax.Array:
    """RMSNorm forward matching the PyTorch module (float32 output by default).

    For bf16 pipelines pass out_dtype=x.dtype to halve writeback bytes
    (opt-in; deviates from the module's f32-output semantics).
    """
    b, s, d = x.shape
    assert weight.shape == (d,)
    out_dtype = jnp.float32 if out_dtype is None else out_dtype

    rows = b * s
    x2d = x.reshape(rows, d)

    # Lane-dense feature dim: pad to a multiple of 128 so stores are unmasked.
    # Zero columns contribute 0 to the sum of squares; inv_d stays 1/original_d.
    d_pad = ((d + 127) // 128) * 128
    if d_pad != d:
        x2d = jnp.pad(x2d, ((0, 0), (0, d_pad - d)))
        w2d = jnp.pad(weight, (0, d_pad - d)).reshape(1, d_pad)
    else:
        w2d = weight.reshape(1, d_pad)

    in_bytes = jnp.dtype(x.dtype).itemsize
    out_bytes = jnp.dtype(out_dtype).itemsize
    sub = _sublane_multiple(x.dtype, out_dtype)

    if block_rows is not None:
        ts = min(block_rows, rows)
        if ts < rows and ts % sub != 0:
            ts = max((ts // sub) * sub, sub)  # dtype-aware sublane rounding
    else:
        ts = _pick_block_rows(rows, d_pad, in_bytes, out_bytes, sub)

    grid = (pl.cdiv(rows, ts),)

    # Explicit VMEM limit: working set + headroom, well under physical VMEM.
    cap = _vmem_capacity_bytes()
    working = ts * d_pad * (2 * in_bytes + 2 * out_bytes + 4) + 2 * d_pad * 4
    vmem_limit = int(min(max(working + (4 << 20), 16 << 20), cap - (8 << 20)))

    kernel = functools.partial(rmsnorm_kernel, eps=eps, inv_d=1.0 / d)

    out = pl.pallas_call(
        kernel,
        out_shape=jax.ShapeDtypeStruct((rows, d_pad), out_dtype),
        grid=grid,
        in_specs=[
            pl.BlockSpec((ts, d_pad), lambda i: (i, 0)),
            pl.BlockSpec((1, d_pad), lambda i: (0, 0)),   # weight stays resident
        ],
        out_specs=pl.BlockSpec((ts, d_pad), lambda i: (i, 0)),
        compiler_params=pltpu.CompilerParams(
            dimension_semantics=("parallel",),
            vmem_limit_bytes=vmem_limit,
        ),
    )(x2d, w2d)

    if d_pad != d:
        out = out[:, :d]
    return out.reshape(b, s, d)


def rmsnorm_ref(x, weight, eps=1e-5):
    x = x.astype(jnp.float32)
    ms = jnp.mean(x * x, axis=-1, keepdims=True)
    rms = jnp.sqrt(ms + eps)
    return x / rms * weight.astype(jnp.float32)


if __name__ == "__main__":
    key = jax.random.PRNGKey(0)
    b, s, d = 2, 8, 32
    x = jax.random.normal(key, (b, s, d), dtype=jnp.float32)
    # Deterministic parameter init, matching init.ones_(self.weight)
    weight = jnp.ones((d,), dtype=jnp.float32)

    y = rmsnorm(x, weight, eps=1e-5)
    jax.block_until_ready(y)

    y_ref = rmsnorm_ref(x, weight, eps=1e-5)
    assert y.shape == (b, s, d) and y.dtype == jnp.float32
    assert jnp.allclose(y, y_ref, atol=1e-5, rtol=1e-5)
    print("KERNEL_OK")
</pallas_src>

<mosaic_0001>
module attributes {stable_mosaic.version = 11 : i64} {
  func.func @rmsnorm_kernel(%arg0: i32, %arg1: memref<16x128xf32, #tpu.memory_space<vmem>>, %arg2: memref<1x128xf32, #tpu.memory_space<vmem>>, %arg3: memref<16x128xf32, #tpu.memory_space<vmem>>) attributes {dimension_semantics = [#tpu.dimension_semantics<parallel>], iteration_bounds = array<i64: 1>, scalar_prefetch = 0 : i64, scratch_operands = 0 : i64, tpu.core_type = #tpu.core_type<tc>, window_params = [{transform_indices = @transform_0, window_bounds = array<i64: 16, 128>}, {pipeline_mode = #tpu.pipeline_mode<synchronous>, transform_indices = @transform_1, window_bounds = array<i64: 1, 128>}, {transform_indices = @transform_2, window_bounds = array<i64: 16, 128>}]} {
    %c0 = arith.constant 0 : index
    %c0_0 = arith.constant 0 : index
    %0 = vector.load %arg1[%c0, %c0_0] : memref<16x128xf32, #tpu.memory_space<vmem>>, vector<16x128xf32>
    %c0_1 = arith.constant 0 : index
    %c0_2 = arith.constant 0 : index
    %1 = vector.load %arg2[%c0_1, %c0_2] : memref<1x128xf32, #tpu.memory_space<vmem>>, vector<1x128xf32>
    %2 = arith.mulf %0, %0 : vector<16x128xf32>
    %cst = arith.constant dense<0.000000e+00> : vector<16xf32>
    %3 = vector.multi_reduction <add>, %2, %cst [1] : vector<16x128xf32> to vector<16xf32>
    %4 = vector.shape_cast %3 : vector<16xf32> to vector<16x1xf32>
    %cst_3 = arith.constant 3.125000e-02 : f32
    %5 = vector.broadcast %cst_3 : f32 to vector<16x1xf32>
    %6 = arith.mulf %4, %5 : vector<16x1xf32>
    %cst_4 = arith.constant 9.99999974E-6 : f32
    %7 = vector.broadcast %cst_4 : f32 to vector<16x1xf32>
    %8 = arith.addf %6, %7 : vector<16x1xf32>
    %9 = math.rsqrt %8 : vector<16x1xf32>
    %10 = vector.broadcast %9 : vector<16x1xf32> to vector<16x128xf32>
    %11 = arith.mulf %0, %10 : vector<16x128xf32>
    %12 = vector.broadcast %1 : vector<1x128xf32> to vector<16x128xf32>
    %13 = arith.mulf %11, %12 : vector<16x128xf32>
    %c0_5 = arith.constant 0 : index
    %c0_6 = arith.constant 0 : index
    %14 = vector.load %arg3[%c0_5, %c0_6] : memref<16x128xf32, #tpu.memory_space<vmem>>, vector<16x128xf32>
    tpu.vector_store %arg3[%c0_5, %c0_6], %13 {strides = array<i32>} : memref<16x128xf32, #tpu.memory_space<vmem>>, vector<16x128xf32>,
    return
  }
  func.func @transform_0(%arg0: i32) -> (i32, i32) {
    %c0_i32 = arith.constant 0 : i32
    %c0_i32_0 = arith.constant 0 : i32
    return %arg0, %c0_i32 : i32, i32
  }
  func.func @transform_1(%arg0: i32) -> (i32, i32) {
    %c0_i32 = arith.constant 0 : i32
    %c0_i32_0 = arith.constant 0 : i32
    %c0_i32_1 = arith.constant 0 : i32
    return %c0_i32, %c0_i32_0 : i32, i32
  }
  func.func @transform_2(%arg0: i32) -> (i32, i32) {
    %c0_i32 = arith.constant 0 : i32
    %c0_i32_0 = arith.constant 0 : i32
    return %arg0, %c0_i32 : i32, i32
  }
}

</mosaic_0001>

<bundles_post_ra>
// kernel: tpu_custom_call.1
= control target key start
LH: loop header
LB: loop body
LE: loop exit
PB: predicated region body
PF: predicated region fallthrough
CT: control target
= control target key end

     0   :  { %7 = vsyncpa [#allocation3], 0  ;;  %s227_s0 = inlined_call_operand.hbm [shape: f32[16,128], index: 0, kind: input, shape index: {}]   ;;  %s228_s1 = inlined_call_operand.hbm [shape: f32[1,128], index: 1, kind: input, shape index: {}]   ;;  %s229_s2 = inlined_call_operand.hbm [shape: f32[16,128], index: 2, kind: output, shape index: {}]  }
   0x1   :  { %8 = vsyncpa [#allocation6], 0 }
   0x2   :  { %9 = vsyncpa [#allocation4], 0  ;;  %s14_s11 = sshll.u32 %s227_s0, 4  ;;  %s192_s12 = smov [#allocation2]   ;;  %s15_s11 = int_to_ptr.hbm [resolvable:$true] %s14_s11 }
   0x3   :  { %s16_s13 = sshll.u32 %s192_s12, 4  ;;  %s28_s16 = sshll.u32 %s228_s1, 4  ;;  %s17_s13 = int_to_ptr.vmem [resolvable:$true] %s16_s13  ;;  %s29_s16 = int_to_ptr.hbm [resolvable:$true] %s28_s16 }
   0x4   :  { %s193_s17 = smov 128   ;;  %s194_s18 = smov 8  }
   0x5   :  { %22 = dma.hbm_to_vmem [thread:$0]  %s15_s11, 256, %s17_s13, [#allocation3], %s193_s17, %s193_s17, %s194_s18  }
   0x6   :  { %s195_s19 = smov [#allocation5]  }
   0x7   :  { %s30_s20 = sshll.u32 %s195_s19, 4  ;;  %s31_s20 = int_to_ptr.vmem [resolvable:$true] %s30_s20 }
   0x8   :  { %33 = dma.hbm_to_vmem [thread:$0]  %s29_s16, 16, %s31_s20, [#allocation6]  }
   0x9   :  { %186 = dma.done.wait [#allocation3], 256  }
   0xa   :  { %187 = vsyncadd [#allocation3], 4294967040 }
   0xb   :  { %188 = dma.done.wait [#allocation6], 16  }
   0xc   :  { %189 = vsyncadd [#allocation6], 4294967280  ;;  %v42_v0 = vld [vmem:[#allocation2] sm:$0xff]  ;;  %v43_v2 = vld [vmem:[#allocation2 + $0x8] sm:$0xff]  ;;  %s196_s0 = smov [#allocation7]   ;;  %s90_s23 = sshll.u32 %s229_s2, 4  ;;  %s91_s23 = int_to_ptr.hbm [resolvable:$true] %s90_s23 }
   0xd   :  { %v45_v1 = vmul.f32 %v42_v0, %v42_v0  ;;  %v46_v3 = vmul.f32 %v43_v2, %v43_v2  ;;  %v109_v18 = vld [vmem:[#allocation5] ss:$0 sm:$0xff]  ;;  %s88_s1 = sshll.u32 %s196_s0, 4  ;;  %s89_s1 = int_to_ptr.vmem [resolvable:$true] %s88_s1 }
   0xf   :  { %47 = vadd.xlane.f32.xlu0 %v45_v1 }
  0x17   :  { %49 = vadd.xlane.f32.xlu0 %v46_v3 }
  0x82   :  { %v48_v4 = vpop.xlane.xlu0 %47 }
  0x83   :  { %v51_v5 = vmul.f32 0.03125, %v48_v4 }
  0x85   :  { %v53_v6 = vadd.f32 1e-05, %v51_v5 }
  0x87   :  { %110 = vrsqrt.f32 %v53_v6  ;;  %vm61_vm1 = vweird.f32 %v53_v6 }
  0x8a   :  { %v50_v7 = vpop.xlane.xlu0 %49 }
  0x8b   :  { %v52_v8 = vmul.f32 0.03125, %v50_v7 }
  0x8d   :  { %v111_v9 = vpop.eup %110  ;;  %v54_v10 = vadd.f32 1e-05, %v52_v8 }
  0x8e   :  { %v56_v11 = vmul.f32 %v111_v9, %v53_v6  ;;  %vm62_vm0 = vweird.f32 %v111_v9 }
  0x8f   :  { %112 = vrsqrt.f32 %v54_v10  ;;  %vm63_vm2 = vmor %vm61_vm1, %vm62_vm0  ;;  %vm71_vm4 = vweird.f32 %v54_v10 }
  0x90   :  { %v57_v12 = vmul.f32 %v111_v9, %v56_v11 }
  0x92   :  { %v58_v13 = vmul.f32 0.5, %v57_v12 }
  0x94   :  { %v59_v14 = vsub.f32 1.5, %v58_v13 }
  0x95   :  { %v113_v15 = vpop.eup %112 }
  0x96   :  { %v60_v16 = vmul.f32 %v111_v9, %v59_v14  ;;  %v66_v17 = vmul.f32 %v113_v15, %v54_v10  ;;  %vm72_vm3 = vweird.f32 %v113_v15 }
  0x97   :  { %vm73_vm5 = vmor %vm71_vm4, %vm72_vm3 }
  0x98   :  { %v64_v19 = vsel %vm63_vm2, %v111_v9, %v60_v16  ;;  %v67_v20 = vmul.f32 %v113_v15, %v66_v17 }
  0x99   :  { %v75_v21 = vmul.f32 %v64_v19, %v42_v0 }
  0x9a   :  { %v68_v22 = vmul.f32 0.5, %v67_v20 }
  0x9b   :  { %v80_v23 = vmul.f32 %v109_v18, %v75_v21 }
  0x9c   :  { %v69_v24 = vsub.f32 1.5, %v68_v22 }
  0x9d   :  { %82 = vst [vmem:[#allocation7] sm:$0xff] %v80_v23 }
  0x9e   :  { %v70_v25 = vmul.f32 %v113_v15, %v69_v24 }
  0xa0   :  { %v74_v26 = vsel %vm73_vm5, %v113_v15, %v70_v25 }
  0xa1   :  { %v76_v27 = vmul.f32 %v74_v26, %v43_v2 }
  0xa3   :  { %v81_v28 = vmul.f32 %v109_v18, %v76_v27 }
  0xa5   :  { %83 = vst [vmem:[#allocation7 + $0x8] sm:$0xff] %v81_v28 }
  0xa6   :  { %96 = dma.vmem_to_hbm [thread:$0]  %s89_s1, 256, %s91_s23, [#allocation4], %s193_s17, %s193_s17, %s194_s18  }
  0xa7   :  { %190 = dma.done.wait [#allocation4], 256  }
  0xa8   :  { %191 = vsyncadd [#allocation4], 4294967040 }
  0xa9   :  { %101 = vsyncpa [#allocation3], 1 }
  0xaa   :  { %102 = vsyncpa [#allocation6], 1 }
  0xab   :  { %103 = vsyncpa [#allocation4], 1 }

</bundles_post_ra>
